<compile_context>
chip_gen: v6e
topology: v6e:2x2x1
jax: 0.10.0
libtpu: 0.0.40
codegen_flags: <defaults>
</compile_context>

<pallas_src>
import functools

import jax
import jax.numpy as jnp
from jax.experimental import pallas as pl
from jax.experimental.pallas import tpu as pltpu


def _round_up(x, m):
    return ((x + m - 1) // m) * m


def _cdiv(a, b):
    return (a + b - 1) // b


def _velocity_consistency_kernel(v_ref, g_ref, out_ref, w_ref, acc_ref, *,
                                 consistency_weight, n_elements, n_genes,
                                 tile_genes, tiles_per_core, ragged):
    c = pl.program_id(0)   # core-split half of the gene tiles ("parallel")
    j = pl.program_id(1)   # gene tile within this half ("arbitrary" reduction axis)

    @pl.when(j == 0)
    def _init():
        # One-time per core: pre-scaled L1-row-normalized graph, kept resident in
        # VMEM in f32 so the inner loop is a single matmul.
        g32 = g_ref[...].astype(jnp.float32)                      # (B, B)
        row_l1 = jnp.sum(jnp.abs(g32), axis=1, keepdims=True)     # (B, 1)
        # F.normalize(p=1, dim=1): rows scaled by 1 / max(||row||_1, 1e-12).
        # approx=False (exact divide) on purpose -> matches the f32 reference.
        inv_row = pl.reciprocal(jnp.maximum(row_l1, 1e-12))
        w_ref[...] = g32 * inv_row
        acc_ref[...] = jnp.zeros_like(acc_ref)

    v = v_ref[...].astype(jnp.float32)                            # (B, TG)
    # weights @ v with the normalization already folded into resident W.
    neighbor_v = jnp.dot(w_ref[...], v, preferred_element_type=jnp.float32)
    diff = v - neighbor_v
    sq = diff * diff
    if ragged:
        # Ragged last tile handled in-kernel (no jnp.pad HBM copy): columns whose
        # global gene index >= n_genes hold unspecified data -> force them to 0.
        # (Matmul columns are independent, so garbage columns never contaminate
        # valid columns of neighbor_v.)
        col0 = (c * tiles_per_core + j) * tile_genes
        col = col0 + jax.lax.broadcasted_iota(jnp.int32, sq.shape, 1)
        sq = jnp.where(col < n_genes, sq, 0.0)
    # (B, 1) vector accumulator: avoids a full reduce-to-scalar + SMEM RMW per step.
    acc_ref[...] += jnp.sum(sq, axis=1, keepdims=True)

    @pl.when(j == pl.num_programs(1) - 1)
    def _finalize():
        total = jnp.sum(acc_ref[...], keepdims=True)              # (1, 1)
        scale = consistency_weight / n_elements
        out_ref[...] = jnp.broadcast_to(total * scale, out_ref.shape)


def velocity_consistency_loss(predicted_velocity, expression_graph,
                              current_expression=None,
                              consistency_weight: float = 1.0,
                              tile_genes=None,
                              target_tile_bytes: int = 2 << 20,
                              vmem_budget_bytes: int = 40 << 20):
    """Pallas TPU forward of VelocityConsistencyLoss.

    `current_expression` is accepted to keep the module call signature, but the
    reference forward only uses it in dead code (`next_state` is unused), so it is
    never passed to the kernel and never DMA'd.
    """
    B, G = predicted_velocity.shape
    assert expression_graph.shape == (B, B)
    if current_expression is not None:
        assert current_expression.shape == (B, G)

    v_itemsize = jnp.dtype(predicted_velocity.dtype).itemsize
    g_itemsize = jnp.dtype(expression_graph.dtype).itemsize
    G128 = _round_up(G, 128)

    if tile_genes is None:
        # Size the gene tile by bytes: big enough (~target_tile_bytes of streamed v)
        # to amortize the ~0.35 us per-step pipeline overhead, small enough to keep
        # the double-buffered input + f32 working set inside the VMEM budget
        # (sized for v7x's 64 MiB-per-core parts; v5e/v6e have more headroom).
        tg = _round_up(max(128, target_tile_bytes // max(1, B * v_itemsize)), 128)
        per_gene_bytes = B * (2 * v_itemsize + 4 * 4)   # 2x buffered input + ~4 f32 temps/col
        resident = 2 * B * B * g_itemsize + B * B * 4 + 4 * B
        cap = max(128, ((vmem_budget_bytes - resident) // per_gene_bytes) // 128 * 128)
        tg = min(tg, cap, G128)
        # Prefer an even tile count so the v7x 2-TensorCore split can engage.
        t = _cdiv(G, tg)
        if t > 1 and t % 2 == 1:
            tg_alt = _round_up(_cdiv(G, t + 1), 128)
            if tg_alt >= 128 and _cdiv(G, tg_alt) % 2 == 0:
                tg = tg_alt
    else:
        tg = min(_round_up(tile_genes, 128), G128)
    TG = max(128, tg)

    total_tiles = _cdiv(G, TG)
    # Leading "parallel" axis of size 2 -> both TensorCores on v7x; harmless
    # (sequential, still correct) on 1-TC v5e/v6e.
    num_cores = 2 if (total_tiles >= 2 and total_tiles % 2 == 0) else 1
    tiles_per_core = total_tiles // num_cores
    ragged = (G % TG) != 0

    kernel = functools.partial(
        _velocity_consistency_kernel,
        consistency_weight=float(consistency_weight),
        n_elements=float(B * G),          # unpadded element count
        n_genes=G,
        tile_genes=TG,
        tiles_per_core=tiles_per_core,
        ragged=ragged)

    out = pl.pallas_call(
        kernel,
        out_shape=jax.ShapeDtypeStruct((1, num_cores * 128), jnp.float32),
        grid=(num_cores, tiles_per_core),
        in_specs=[
            # predicted_velocity gene tile (native dtype; upcast once in-kernel)
            pl.BlockSpec((B, TG), lambda c, j: (0, c * tiles_per_core + j)),
            # graph: constant block index -> fetched once per core, stays resident
            pl.BlockSpec((B, B), lambda c, j: (0, 0)),
        ],
        # Lane-dense per-core partial-loss block; summed in JAX after the call.
        out_specs=pl.BlockSpec((1, 128), lambda c, j: (0, c)),
        scratch_shapes=[
            pltpu.VMEM((B, B), jnp.float32),   # W = L1-normalized graph (resident)
            pltpu.VMEM((B, 1), jnp.float32),   # per-row running sum of squared diffs
        ],
        compiler_params=pltpu.CompilerParams(
            dimension_semantics=("parallel", "arbitrary"),
            vmem_limit_bytes=48 * 1024 * 1024),
    )(predicted_velocity, expression_graph)

    partials = out.reshape(num_cores, 128)[:, 0]
    return jnp.sum(partials)


def _reference_loss(predicted_velocity, expression_graph, current_expression=None,
                    consistency_weight: float = 1.0):
    """Pure-JAX reference mirroring the PyTorch forward."""
    row_l1 = jnp.sum(jnp.abs(expression_graph), axis=1, keepdims=True)
    weights = expression_graph / jnp.maximum(row_l1, 1e-12)
    neighbor_v = weights @ predicted_velocity
    return consistency_weight * jnp.mean((predicted_velocity - neighbor_v) ** 2)


if __name__ == "__main__":
    key = jax.random.PRNGKey(0)
    k1, k2, k3 = jax.random.split(key, 3)

    batch, n_genes = 8, 1000   # ragged gene axis (1000 % 128 != 0)
    predicted_velocity = jax.random.normal(k1, (batch, n_genes), dtype=jnp.float32)
    # Non-negative similarity graph (typical adjacency), but the code is generic.
    expression_graph = jnp.abs(jax.random.normal(k2, (batch, batch), dtype=jnp.float32))
    current_expression = jax.random.normal(k3, (batch, n_genes), dtype=jnp.float32)

    consistency_weight = 1.5

    # Multi-tile path: 8 tiles of 128 genes -> 2-way core split (grid (2, 4)),
    # ragged last tile masked in-kernel (columns 1000..1023 contribute 0).
    loss = velocity_consistency_loss(predicted_velocity, expression_graph,
                                     current_expression, consistency_weight,
                                     tile_genes=128)
    loss = jax.block_until_ready(loss)
    ref = _reference_loss(predicted_velocity, expression_graph, current_expression,
                          consistency_weight)
    assert jnp.allclose(loss, ref, rtol=1e-5, atol=1e-6), (loss, ref)

    # Auto-sized path: the byte-budgeted tile covers all genes -> grid (1, 1),
    # no ragged masking, single resident tile.
    v2 = predicted_velocity[:, :256]
    loss2 = velocity_consistency_loss(v2, expression_graph, None, consistency_weight)
    loss2 = jax.block_until_ready(loss2)
    ref2 = _reference_loss(v2, expression_graph, None, consistency_weight)
    assert jnp.allclose(loss2, ref2, rtol=1e-5, atol=1e-6), (loss2, ref2)

    print("KERNEL_OK")
</pallas_src>

<mosaic_0001>
module attributes {stable_mosaic.version = 11 : i64} {
  func.func @_velocity_consistency_kernel(%arg0: i32, %arg1: i32, %arg2: memref<8x128xf32, #tpu.memory_space<vmem>>, %arg3: memref<8x8xf32, #tpu.memory_space<vmem>>, %arg4: memref<1x128xf32, #tpu.memory_space<vmem>>, %arg5: memref<8x8xf32, #tpu.memory_space<vmem>>, %arg6: memref<8x1xf32, #tpu.memory_space<vmem>>) attributes {dimension_semantics = [#tpu.dimension_semantics<parallel>, #tpu.dimension_semantics<arbitrary>], iteration_bounds = array<i64: 2, 4>, scalar_prefetch = 0 : i64, scratch_operands = 2 : i64, tpu.core_type = #tpu.core_type<tc>, window_params = [{transform_indices = @transform_0, window_bounds = array<i64: 8, 128>}, {pipeline_mode = #tpu.pipeline_mode<synchronous>, transform_indices = @transform_1, window_bounds = array<i64: 8, 8>}, {transform_indices = @transform_2, window_bounds = array<i64: 1, 128>}]} {
    %c0_i32 = arith.constant 0 : i32
    %0 = arith.cmpi eq, %arg1, %c0_i32 : i32
    %1 = arith.extui %0 : i1 to i32
    %c0_i32_0 = arith.constant 0 : i32
    %2 = arith.cmpi ne, %1, %c0_i32_0 : i32
    scf.if %2 {
      %c0_11 = arith.constant 0 : index
      %c0_12 = arith.constant 0 : index
      %26 = vector.load %arg3[%c0_11, %c0_12] : memref<8x8xf32, #tpu.memory_space<vmem>>, vector<8x8xf32>
      %27 = math.absf %26 : vector<8x8xf32>
      %cst_13 = arith.constant dense<0.000000e+00> : vector<8xf32>
      %28 = vector.multi_reduction <add>, %27, %cst_13 [1] : vector<8x8xf32> to vector<8xf32>
      %29 = vector.shape_cast %28 : vector<8xf32> to vector<8x1xf32>
      %cst_14 = arith.constant 9.99999996E-13 : f32
      %30 = vector.broadcast %cst_14 : f32 to vector<8x1xf32>
      %31 = arith.maximumf %29, %30 : vector<8x1xf32>
      %32 = tpu.reciprocal %31 : vector<8x1xf32> -> vector<8x1xf32>
      %33 = vector.broadcast %32 : vector<8x1xf32> to vector<8x8xf32>
      %34 = arith.mulf %26, %33 : vector<8x8xf32>
      %c0_15 = arith.constant 0 : index
      %c0_16 = arith.constant 0 : index
      %35 = vector.load %arg5[%c0_15, %c0_16] : memref<8x8xf32, #tpu.memory_space<vmem>>, vector<8x8xf32>
      tpu.vector_store %arg5[%c0_15, %c0_16], %34 {strides = array<i32>} : memref<8x8xf32, #tpu.memory_space<vmem>>, vector<8x8xf32>,
      %cst_17 = arith.constant 0.000000e+00 : f32
      %36 = vector.broadcast %cst_17 : f32 to vector<8x1xf32>
      %c0_18 = arith.constant 0 : index
      %c0_19 = arith.constant 0 : index
      %37 = vector.load %arg6[%c0_18, %c0_19] : memref<8x1xf32, #tpu.memory_space<vmem>>, vector<8x1xf32>
      tpu.vector_store %arg6[%c0_18, %c0_19], %36 {strides = array<i32>} : memref<8x1xf32, #tpu.memory_space<vmem>>, vector<8x1xf32>,
    } else {
    }
    %c0 = arith.constant 0 : index
    %c0_1 = arith.constant 0 : index
    %3 = vector.load %arg2[%c0, %c0_1] : memref<8x128xf32, #tpu.memory_space<vmem>>, vector<8x128xf32>
    %c0_2 = arith.constant 0 : index
    %c0_3 = arith.constant 0 : index
    %4 = vector.load %arg5[%c0_2, %c0_3] : memref<8x8xf32, #tpu.memory_space<vmem>>, vector<8x8xf32>
    %cst = arith.constant dense<0.000000e+00> : vector<8x128xf32>
    %5 = tpu.matmul %4, %3, %cst {dimension_numbers = #tpu.dot_dimension_numbers<[1], [0], [0], [1], [0, 0, 1, 1], [], []>} : vector<8x8xf32>, vector<8x128xf32>, vector<8x128xf32> -> vector<8x128xf32>
    %6 = arith.subf %3, %5 : vector<8x128xf32>
    %7 = arith.mulf %6, %6 : vector<8x128xf32>
    %c4_i32 = arith.constant 4 : i32
    %8 = arith.muli %arg0, %c4_i32 : i32
    %9 = arith.addi %8, %arg1 : i32
    %c128_i32 = arith.constant 128 : i32
    %10 = arith.muli %9, %c128_i32 : i32
    %11 = tpu.iota {dimensions = array<i32: 1>} : vector<8x128xi32>
    %12 = vector.broadcast %10 : i32 to vector<8x128xi32>
    %13 = arith.addi %12, %11 : vector<8x128xi32>
    %c1000_i32 = arith.constant 1000 : i32
    %14 = vector.broadcast %c1000_i32 : i32 to vector<8x128xi32>
    %15 = arith.cmpi slt, %13, %14 : vector<8x128xi32>
    %cst_4 = arith.constant 0.000000e+00 : f32
    %16 = vector.broadcast %cst_4 : f32 to vector<8x128xf32>
    %17 = arith.select %15, %7, %16 : vector<8x128xi1>, vector<8x128xf32>
    %c0_5 = arith.constant 0 : index
    %c0_6 = arith.constant 0 : index
    %18 = vector.load %arg6[%c0_5, %c0_6] : memref<8x1xf32, #tpu.memory_space<vmem>>, vector<8x1xf32>
    %cst_7 = arith.constant dense<0.000000e+00> : vector<8xf32>
    %19 = vector.multi_reduction <add>, %17, %cst_7 [1] : vector<8x128xf32> to vector<8xf32>
    %20 = vector.shape_cast %19 : vector<8xf32> to vector<8x1xf32>
    %21 = arith.addf %18, %20 : vector<8x1xf32>
    %c0_8 = arith.constant 0 : index
    %c0_9 = arith.constant 0 : index
    %22 = vector.load %arg6[%c0_8, %c0_9] : memref<8x1xf32, #tpu.memory_space<vmem>>, vector<8x1xf32>
    tpu.vector_store %arg6[%c0_8, %c0_9], %21 {strides = array<i32>} : memref<8x1xf32, #tpu.memory_space<vmem>>, vector<8x1xf32>,
    %c3_i32 = arith.constant 3 : i32
    %23 = arith.cmpi eq, %arg1, %c3_i32 : i32
    %24 = arith.extui %23 : i1 to i32
    %c0_i32_10 = arith.constant 0 : i32
    %25 = arith.cmpi ne, %24, %c0_i32_10 : i32
    scf.if %25 {
      %c0_11 = arith.constant 0 : index
      %c0_12 = arith.constant 0 : index
      %26 = vector.load %arg6[%c0_11, %c0_12] : memref<8x1xf32, #tpu.memory_space<vmem>>, vector<8x1xf32>
      %27 = vector.shape_cast %26 : vector<8x1xf32> to vector<1x8x1xf32>
      %cst_13 = arith.constant dense<0.000000e+00> : vector<1xf32>
      %28 = vector.multi_reduction <add>, %27, %cst_13 [1, 2] : vector<1x8x1xf32> to vector<1xf32>
      %29 = vector.shape_cast %28 : vector<1xf32> to vector<1x1x1xf32>
      %30 = vector.extract %29[0, 0, 0] : f32 from vector<1x1x1xf32>
      %31 = vector.broadcast %30 : f32 to vector<1x1xf32>
      %cst_14 = arith.constant 1.875000e-04 : f32
      %32 = vector.broadcast %cst_14 : f32 to vector<1x1xf32>
      %33 = arith.mulf %31, %32 : vector<1x1xf32>
      %34 = vector.shape_cast %33 : vector<1x1xf32> to vector<1x1xf32>
      %35 = vector.broadcast %34 : vector<1x1xf32> to vector<1x128xf32>
      %c0_15 = arith.constant 0 : index
      %c0_16 = arith.constant 0 : index
      %36 = vector.load %arg4[%c0_15, %c0_16] : memref<1x128xf32, #tpu.memory_space<vmem>>, vector<1x128xf32>
      tpu.vector_store %arg4[%c0_15, %c0_16], %35 {strides = array<i32>} : memref<1x128xf32, #tpu.memory_space<vmem>>, vector<1x128xf32>,
    } else {
    }
    return
  }
  func.func @transform_0(%arg0: i32, %arg1: i32) -> (i32, i32) {
    %c4_i32 = arith.constant 4 : i32
    %0 = arith.muli %arg0, %c4_i32 : i32
    %1 = arith.addi %0, %arg1 : i32
    %c0_i32 = arith.constant 0 : i32
    %c0_i32_0 = arith.constant 0 : i32
    return %c0_i32, %1 : i32, i32
  }
  func.func @transform_1(%arg0: i32, %arg1: i32) -> (i32, i32) {
    %c0_i32 = arith.constant 0 : i32
    %c0_i32_0 = arith.constant 0 : i32
    %c0_i32_1 = arith.constant 0 : i32
    return %c0_i32, %c0_i32_0 : i32, i32
  }
  func.func @transform_2(%arg0: i32, %arg1: i32) -> (i32, i32) {
    %c0_i32 = arith.constant 0 : i32
    %c0_i32_0 = arith.constant 0 : i32
    return %c0_i32, %arg0 : i32, i32
  }
}

</mosaic_0001>

<bundles_post_ra>
// kernel: tpu_custom_call.1
= control target key start
LH: loop header
LB: loop body
LE: loop exit
PB: predicated region body
PF: predicated region fallthrough
CT: control target
= control target key end

     0   :  { %s984_s0 = inlined_call_operand.hbm [shape: f32[8,1000], index: 0, kind: input, shape index: {}]   ;;  %s985_s1 = inlined_call_operand.hbm [shape: f32[8,8], index: 1, kind: input, shape index: {}]   ;;  %s986_s2 = inlined_call_operand.hbm [shape: f32[1,256], index: 2, kind: output, shape index: {}]  }
   0x1   :  { %994 = sst [smem:[#allocation18_spill]] %s985_s1 }
   0x2   :  { %995 = sst [smem:[#allocation19_spill]] %s986_s2 }
   0x3   :  { %7 = vsyncpa [#allocation5], 0 }
   0x4   :  { %9 = vsyncpa [#allocation5 + $0x1], 0 }
   0x5   :  { %10 = vsyncpa [#allocation8], 0 }
   0x6   :  { %11 = vsyncpa [#allocation6], 0 }
   0x7   :  { %13 = vsyncpa [#allocation6 + $0x1], 0  ;;  %s769_s9 = smov 0   ;;  %s771_s10 = smov 0  }
   0x8   :  { %s773_s11 = smov 0   ;;  %s775_s12 = smov 0  }
   0x9   :  { %s777_s13 = smov 0   ;;  %s779_s14 = smov 0  }
   0xa   :  { %s781_s15 = smov 0   ;;  %s783_s16 = smov 0  }
   0xb   :  { %s785_s17 = smov 0   ;;  %s787_s18 = smov 0  }
   0xc   :  { %s789_s19 = smov 0  }
   0xd LB: > { %996 = sst [smem:[#allocation13_spill]] %s706_s9  ;;  %s420_s20 = sadd.s32 4294967295, %s746_s19   ;;  %s746_s19 = sphi %s789_s19, %s19_s19   ;;  %s742_s18 = sphi %s787_s18, %s1026_s18   ;;  %s738_s17 = sphi %s785_s17, %s1025_s17   ;;  %s734_s16 = sphi %s783_s16, %s1024_s16   ;;  %s730_s15 = sphi %s781_s15, %s1017_s15   ;;  %s726_s14 = sphi %s779_s14, %s1023_s14   ;;  %s722_s13 = sphi %s777_s13, %s1022_s13   ;;  %s718_s12 = sphi %s775_s12, %s1021_s12   ;;  %s714_s11 = sphi %s773_s11, %s1020_s11   ;;  %s710_s10 = sphi %s771_s10, %s1019_s10   ;;  %s706_s9 = sphi %s769_s9, %s1018_s9  }
   0xe   : > { %997 = sst [smem:[#allocation14_spill]] %s734_s16  ;;  %s421_s21 = sadd.s32 4294967294, %s746_s19  }
   0xf   : > { %998 = sst [smem:[#allocation15_spill]] %s738_s17  ;;  %p55_p0 = scmp.ne.s32.totalorder %s722_s13, %s718_s12 }
  0x10   : > { %p825_p1 = scmp.eq.s32.totalorder %s420_s20, 0  ;;  %p99_p2 = scmp.ne.s32.totalorder %s714_s11, %s710_s10 }
  0x11   : > { %p100_p4 = scmp.eq.s32.totalorder %s420_s20, 7  ;;  %p105_p5 = scmp.ne.s32.totalorder %s710_s10, %s706_s9 }
  0x12   : > { %p833_p3 = por %p825_p1, %p55_p0  ;;  %p106_p6 = scmp.eq.s32.totalorder %s421_s21, 7 }
  0x13   : > { %p839_p7 = por %p100_p4, %p99_p2  ;;  %p424_p8 = scmp.ge.s32.totalorder %s746_s19, 1 }
  0x14   : > { %p844_p9 = por %p106_p6, %p105_p5  ;;  %p113_p10 = scmp.lt.s32.totalorder %s746_s19, 9 }
  0x15   : > { %s1001_s24 = scalar_select %p839_p7, 1, 0 }
  0x16   : > { %s1003_s25 = scalar_select %p844_p9, 1, 0 }
  0x17   : > { %1002 = sst [smem:[#allocation16_spill]] %s1001_s24  ;;  %p849_p11 = pnand %p424_p8, %p113_p10 }
  0x18   : > { %1004 = sst [smem:[#allocation17_spill]] %s1003_s25  ;;  %s748_s27 = smov [#allocation7]  }
  0x19   : > { %s126_s28 = sshll.u32 %s748_s27, 4  ;;  %s89_s29 = sadd.s32 1, %s714_s11  ;;  %s127_s28 = int_to_ptr.vmem [resolvable:$true] %s126_s28 }
  0x1a   : > { %p458_p12 = pneg %p849_p11  ;;  %s28_s30 = sadd.s32 1, %s738_s17 }
  0x1b   : > { %s579_s3 = scalar_lea.vmem %s127_s28, 128  ;;  %p587_p6 = scmp.lt.s32.totalorder %s127_s28, %s127_s28 }
  0x1c   : > { %p459_p13 = pnand %p458_p12, %p825_p1  ;;  %p580_p2 = scmp.ne.s32.totalorder %s127_s28, %s579_s3 }
  0x1d   : > { %p588_p8 = scmp.lt.s32.totalorder %s579_s3, %s579_s3 }
  0x1e   : > { %p570_p0 = pneg %p459_p13 }
  0x1f   : > { %p589_p10 = por %p588_p8, %p587_p6 }
  0x20   : > { %p582_p4 = pnand %p580_p2, %p570_p0 }
  0x22   : > { %p583_p5 = pneg %p582_p4 }
  0x24   : > { %p590_p9 = pnand %p589_p10, %p583_p5 }
  0x26   : > { %593 = shalt.err (!%p590_p9)
}
  0x27   : > { %s1006_s1 = sld [smem:[#allocation18_spill]]  ;;  %p29_p12 = scmp.ge.s32.totalorder %s28_s30, 4 }
  0x28   : > { %s31_s6 = sadd.s32 1, %s742_s18  ;;  %s422_s7 = sshll.u32 %s742_s18, 2 }
  0x29   : > { %s1028_s30 = smov (%p29_p12, %s28_s30), 0  ;;  %s1030_s6 = smov (!%p29_p12, %s31_s6), %s742_s18 }
  0x2a   : > { %s42_s8 = sadd.s32 1, %s726_s14  ;;  %p49_p9 = scmp.ne.s32.totalorder %s726_s14, %s722_s13 }
  0x2b   : > { %p33_p0 = scmp.ge.s32.totalorder %s1030_s6, 2  ;;  %p50_p2 = scmp.eq.s32.totalorder %s746_s19, 0 }
  0x2c   : > { %s36_s12 = sadd.s32 %s738_s17, %s422_s7  ;;  %p471_p4 = scmp.lt.s32.totalorder %s746_s19, 8 }
  0x2d   : > { %461 = dma.hbm_to_vmem [thread:$0]  (!%p459_p13), %s1006_s1, 128, %s127_s28, [#allocation8]  }
  0x2e   : > { %s1032_s6 = smov (%p33_p0, %s1030_s6), 0  ;;  %p875_p13 = por %p50_p2, %p49_p9 }
  0x2f   : > { %s137_s21 = sand.u32 1, %s726_s14   ;;  %s423_s27 = sshll.u32 %s1032_s6, 2 }
  0x30   : > { %s86_s28 = ssub.s32 %s742_s18, %s1032_s6  ;;  %s38_s3 = sadd.s32 %s423_s27, %s1028_s30 }
  0x31   : > { %p87_p5 = scmp.eq.s32.totalorder %s86_s28, 0  ;;  %s39_s4 = ssub.s32 %s36_s12, %s38_s3 }
  0x32   : > { %s427_s5 = sshll.u32 %s137_s21, 3  ;;  %p40_p6 = scmp.eq.s32.totalorder %s39_s4, 0 }
  0x33   : > { %s887_s7 = scalar_select %p87_p5, %s714_s11, %s89_s29  }
  0x34   : > { %s890_s1 = scalar_select %p40_p6, %s726_s14, %s42_s8  }
  0x35   : > { %s429_s17 = sshll.u32 %s36_s12, 7  ;;  %s141_s25 = scalar_lea.vmem [#allocation4], %s427_s5 }
  0x36   : > { %s150_s9 = sshll.u32 %s141_s25, 4  ;;  %s148_s16 = scalar_lea.hbm %s984_s0, %s429_s17  ;;  %s151_s9 = int_to_ptr.vmem [resolvable:$true] %s150_s9 }
  0x37   : > { %p899_p8 = pnand %p471_p4, %p875_p13  ;;  %s138_s28 = scalar_lea.sflag [#allocation5], %s137_s21 }
  0x38   : > { %s607_s29 = scalar_lea.vmem %s151_s9, 128  ;;  %s749_s25 = smov [#allocation4]  }
  0x39   : > { %p596_p10 = pneg %p899_p8  ;;  %p608_p12 = scmp.ne.s32.totalorder %s151_s9, %s607_s29 }
  0x3a   : > { %s612_s8 = sshll.u32 %s749_s25, 4  ;;  %s613_s8 = int_to_ptr.vmem [resolvable:$false] %s612_s8 }
  0x3b   : > { %p610_p9 = pnand %p608_p12, %p596_p10  ;;  %s614_s2 = scalar_lea.vmem %s613_s8, 256 }
  0x3c   : > { %p615_p2 = scmp.lt.s32.totalorder %s151_s9, %s613_s8  ;;  %p616_p5 = scmp.lt.s32.totalorder %s614_s2, %s607_s29 }
  0x3d   : > { %p611_p0 = pneg %p610_p9 }
  0x3e   : > { %p617_p6 = por %p616_p5, %p615_p2 }
  0x40   : > { %p618_p7 = pnand %p617_p6, %p611_p0 }
  0x42   : > { %621 = shalt.err (!%p618_p7)
}
  0x43   : > { %465 = dma.hbm_to_vmem [thread:$0]  (!%p899_p8), %s148_s16, 128, %s151_s9, %s138_s28  }
  0x44   : > { %159 = sbr.rel (%p849_p11) target bundleno = 829 (0x33d), region = 28  ;;  %s161_s17 = sand.u32 (!%p849_p11), 1, %s722_s13  }
  0x45   : > { %s431_s24 = sshll.u32 (!%p849_p11), %s161_s17, 3  ;;  %s162_s12 = scalar_lea.sflag (!%p849_p11), [#allocation5], %s161_s17 }
  0x46   : > { %s165_s20 = scalar_lea.vmem (!%p849_p11), [#allocation4], %s431_s24 }
  0x49   : > { %693 = dma.done.wait (%p833_p3), %s162_s12, 128  }
  0x4a   : > { %695 = vsyncadd (%p833_p3), %s162_s12, 4294967168 }
  0x4b   : > { %697 = dma.done.wait (%p825_p1), [#allocation8], 128  }
  0x4c   : > { %699 = vsyncadd (%p825_p1), [#allocation8], 4294967168  ;;  %s187_s9 = sand.u32 1, %s710_s10   ;;  %p433_p7 = scmp.ne.s32.totalorder %s730_s15, 0 }
  0x4d   : > { %s921_s16 = scalar_lea.vmem [#allocation9], %s187_s9 }
  0x4e   : > { %194 = sbr.rel (%p433_p7) target bundleno = 244 (0xf4), region = 40 }
  0x53   : > { %v195_v0 = vld [vmem:[#allocation7] sm:$0xff]  ;;  %vm197_vm0 = vcmask 64512   ;;  %vm205_vm1 = vcmask 7168   ;;  %v750_v3 = vmov 0.0  }
  0x54   : > { %v196_v1 = vand.u32 2147483647, %v195_v0  ;;  %206 = vst.msk [vmem:[#allocation3] sm:$0xff] %vm205_vm1, %v750_v3 }
  0x56   : > { %v198_v2 = vsel %vm197_vm0, %v196_v1, 0.0 }
  0x57   : > { %199 = vadd.xlane.f32.xlu0 %v198_v2 }
  0xe0   : > { %v200_v4 = vpop.xlane.xlu0 %199 }
  0xe1   : > { %v201_v5 = vmax.f32 %v200_v4, 1e-12 }
  0xe3   : > { %566 = vrcp.f32 %v201_v5 }
  0xf0   : > { %v567_v6 = vpop.eup %566 }
  0xf1   : > { %v203_v7 = vmul.f32 %v567_v6, %v195_v0 }
  0xf3   : > { %204 = vst.msk [vmem:[#allocation2] sm:$0xff] %vm197_vm0, %v203_v7 }
  0xf4 PF: > { %v207_v8 = vld [vmem:[%s165_s20] sm:$0xff]  ;;  %s1009_s22 = sld [smem:[#allocation14_spill]]  ;;  %vm209_vm2 = vcmask 64512   ;;  %v751_v10 = vmov 0.0   ;;  %vm752_vm3 = vmmov 0   ;;  %v288_v11 = vlaneseq  ;;  %v294_v20 = vld [vmem:[#allocation3] sm:$0xff] }
  0xf5   : > { %443 = vmatprep.subr.mxu0 %v751_v10  ;;  %445 = vmatprep.mubr.msk.f32.mxu0 %vm752_vm3, %v751_v10  ;;  %vm298_vm5 = vcmask 7168   ;;  %p437_p1 = scmp.ne.s32.totalorder %s730_s15, 3 }
  0xf6   : > { %444 = vmatpush3.msra.mxu0 %v207_v8  ;;  %v289_v12 = vand.u32 127, %v288_v11 }
  0xfa   : > { %v208_v9 = vld [vmem:[#allocation2] sm:$0xff]  ;;  %s435_s23 = sshll.u32 %s1009_s22, 2 }
  0xfb   : > { %446 = vmatmul.mubr.msk.f32.vlgmr.msra.gmra.mxu0 %vm209_vm2, %v208_v9  ;;  %s286_s26 = sadd.s32 %s730_s15, %s435_s23 }
  0xfc   : > { %s436_s21 = sshll.u32 %s286_s26, 7 }
  0xfd   : > { %v290_v13 = vstv %s436_s21 }
  0xfe   : > { %v291_v14 = vadd.s32 %v290_v13, %v289_v12 }
 0x100   : > { %vm292_vm4 = vcmp.lt.s32.totalorder %v291_v14, 1000 }
 0x1bb   : > { %v279_v15 = vpop.f32.mrf.mxu0 }
 0x1bc   : > { %v283_v16 = vsub.f32 %v207_v8, %v279_v15 }
 0x1bd   : > { %v447_v17 = vpop.f32.mrf.mxu0 }
 0x1be   : > { %v284_v18 = vmul.f32 %v283_v16, %v283_v16 }
 0x1c0   : > { %v293_v19 = vsel %vm292_vm4, %v284_v18, 0.0 }
 0x1c1   : > { %295 = vadd.xlane.f32.xlu0 %v293_v19 }
 0x249   : > { %303 = sbr.rel (%p437_p1) target bundleno = 802 (0x322), region = 44 }
 0x24a   : > { %v296_v21 = vpop.xlane.xlu0 %295 }
 0x24b   : > { %v297_v22 = vadd.f32 %v296_v21, %v294_v20 }
 0x24d   : > { %299 = vst.msk [vmem:[#allocation3] sm:$0xff] %vm298_vm5, %v297_v22 }
 0x254   : > { %v304_v23 = vld [vmem:[#allocation3] sm:$0xff] }
 0x255   : > { %v305_v24 = vsel %vm298_vm5, %v304_v23, 0.0 }
 0x256   : > { %306 = vadd.xlane.f32.xlu0 %v305_v24 }
 0x2df   : > { %v307_v25 = vpop.xlane.xlu0 %306 }
 0x2e0   : > { %v308_v26 = vrot.slane %v307_v25, 4 }
 0x2e2   : > { %v309_v27 = vadd.f32 %v308_v26, %v307_v25 }
 0x2e4   : > { %v310_v28 = vrot.slane %v309_v27, 2 }
 0x2e6   : > { %v311_v29 = vadd.f32 %v310_v28, %v309_v27 }
 0x2e8   : > { %v312_v30 = vrot.slane %v311_v29, 1 }
 0x2ea   : > { %v313_v31 = vadd.f32 %v312_v30, %v311_v29 }
 0x2ec   : > { %448 = vpush %v313_v31 }
 0x31d   : > { %s449_s3 = spop %448 }
 0x31e   : > { %v315_v32 = vstv %s449_s3 }
 0x31f   : > { %v316_v33 = vmul.f32 0.0001875, %v315_v32 }
 0x321   : > { %317 = vst [vmem:[%s921_s16] sm:$0x1] %v316_v33 }
 0x322 PF: > { %s1010_s4 = sld [smem:[#allocation14_spill]]  ;;  %s331_s8 = sshll.u32 %s921_s16, 4  ;;  %s332_s8 = int_to_ptr.vmem [resolvable:$true] %s331_s8 }
 0x323   : > { %s1011_s15 = sld [smem:[#allocation16_spill]]  ;;  %s319_s2 = scalar_lea.sflag [#allocation6], %s187_s9 }
 0x324   : > { %s1012_s29 = sld [smem:[#allocation19_spill]]  ;;  %s622_s17 = scalar_lea.vmem %s332_s8, 16 }
 0x325   : > { %p623_p3 = scmp.ne.s32.totalorder %s332_s8, %s622_s17  ;;  %s753_s24 = smov [#allocation9]  }
 0x326   : > { %s626_s12 = sshll.u32 %s753_s24, 4  ;;  %s627_s12 = int_to_ptr.vmem [resolvable:$false] %s626_s12 }
 0x327   : > { %s628_s20 = scalar_lea.vmem %s627_s12, 32  ;;  %p629_p8 = scmp.lt.s32.totalorder %s332_s8, %s627_s12 }
 0x328   : > { %s438_s5 = sshll.u32 %s1010_s4, 4  ;;  %p630_p10 = scmp.lt.s32.totalorder %s628_s20, %s622_s17 }
 0x329   : > { %p1013_p11 = scmp.ne.s32.totalorder %s1011_s15, 0 }
 0x32a   : > { %s329_s25 = scalar_lea.hbm %s1012_s29, %s438_s5  ;;  %p631_p12 = por %p630_p10, %p629_p8 }
 0x32b   : > { %p624_p4 = pnand %p623_p3, %p1013_p11 }
 0x32d   : > { %p625_p13 = pneg %p624_p4 }
 0x32f   : > { %p632_p9 = pnand %p631_p12, %p625_p13 }
 0x331   : > { %635 = shalt.err (!%p632_p9)
}
 0x332   : > { %s636_s22 = scalar_lea.hbm %s329_s25, 16  ;;  %s640_s23 = scalar_lea.hbm %s1012_s29, 32 }
 0x333   : > { %p637_p0 = scmp.ne.s32.totalorder %s329_s25, %s636_s22  ;;  %p641_p6 = scmp.lt.s32.totalorder %s329_s25, %s1012_s29 }
 0x334   : > { %p642_p7 = scmp.lt.s32.totalorder %s640_s23, %s636_s22 }
 0x335   : > { %p638_p2 = pnand %p637_p0, %p1013_p11 }
 0x336   : > { %p643_p1 = por %p642_p7, %p641_p6 }
 0x337   : > { %p639_p5 = pneg %p638_p2 }
 0x339   : > { %p644_p3 = pnand %p643_p1, %p639_p5 }
 0x33b   : > { %647 = shalt.err (!%p644_p3)
}
 0x33c   : > { %456 = dma.vmem_to_hbm [thread:$0]  (%p1013_p11), %s332_s8, 16, %s329_s25, %s319_s2  }
 0x33d PF: > { %s1014_s3 = sld [smem:[#allocation13_spill]]  ;;  %p473_p4 = scmp.ge.s32.totalorder %s746_s19, 2 }
 0x33e   : > { %s1015_s4 = sld [smem:[#allocation17_spill]] }
 0x343   : > { %s343_s5 = sand.u32 1, %s1014_s3  }
 0x344   : > { %p1016_p13 = scmp.ne.s32.totalorder %s1015_s4, 0  ;;  %s344_s27 = scalar_lea.sflag [#allocation6], %s343_s5 }
 0x346   : > { %p467_p8 = pnand %p473_p4, %p1016_p13 }
 0x348   : > { %p468_p10 = pneg %p467_p8 }
 0x34a   : > { %701 = dma.done.wait (%p468_p10), %s344_s27, 16  }
 0x34b   : > { %703 = vsyncadd (%p468_p10), %s344_s27, 4294967280  ;;  %s19_s19 = sadd.s32 1, %s746_s19   ;;  %s1017_s15 = sld [smem:[#allocation15_spill]] }
 0x34c   : > { %p16_p12 = scmp.ge.s32.totalorder %s19_s19, 10   ;;  %s1018_s9 = smov %s710_s10 }
 0x34d   : > { %s1019_s10 = smov %s714_s11  ;;  %s1020_s11 = smov %s887_s7 }
 0x34e   : > { %s1021_s12 = smov %s722_s13  ;;  %s1022_s13 = smov %s726_s14 }
 0x34f   : > { %s1023_s14 = smov %s890_s1  ;;  %s1024_s16 = smov %s742_s18 }
 0x350   : > { %s1025_s17 = smov %s1028_s30  ;;  %s1026_s18 = smov %s1032_s6 }
 0x351   :  { %18 = sbr.rel (!%p16_p12) target bundleno = 13 (0xd), region = 85 }
 0x356   :  { %348 = vsyncpa [#allocation5], 1 }
 0x357   :  { %350 = vsyncpa [#allocation5 + $0x1], 1 }
 0x358   :  { %351 = vsyncpa [#allocation8], 1 }
 0x359   :  { %352 = vsyncpa [#allocation6], 1 }
 0x35a   :  { %354 = vsyncpa [#allocation6 + $0x1], 1 }

</bundles_post_ra>
